<compile_context>
chip_gen: v5e
topology: v5e:2x2
jax: 0.10.0
libtpu: 0.0.40
codegen_flags: <defaults>
</compile_context>

<pallas_src>
import jax
import jax.numpy as jnp
from jax.experimental import pallas as pl
from jax.experimental.pallas import tpu as pltpu


def mlp_kernel(x_ref,
               w0_ref, b0_ref,
               w1_ref, b1_ref,
               w2_ref, b2_ref,
               w3_ref, b3_ref,
               w4_ref, b4_ref,
               w5_ref, b5_ref,
               out_ref):
    # x arrives f32 from HBM; cast to bf16 in-kernel (no separate XLA pass).
    h = x_ref[...].astype(jnp.bfloat16)

    def hidden(h_bf16, w_ref, b_ref):
        # bf16 x bf16 MXU matmul with f32 accumulation + f32 bias add.
        acc = jnp.dot(h_bf16, w_ref[...], preferred_element_type=jnp.float32)
        y = (acc + b_ref[...]).astype(jnp.bfloat16)
        # sigmoid(y) = 0.5 * tanh(0.5 * y) + 0.5  -> single EUP op, bf16 path.
        return jnp.tanh(y * 0.5) * 0.5 + 0.5

    h = hidden(h, w0_ref, b0_ref)
    h = hidden(h, w1_ref, b1_ref)
    h = hidden(h, w2_ref, b2_ref)
    h = hidden(h, w3_ref, b3_ref)
    h = hidden(h, w4_ref, b4_ref)

    # Final layer + log_softmax in f32.
    logits = jnp.dot(h, w5_ref[...], preferred_element_type=jnp.float32) + b5_ref[...]
    m = jnp.max(logits, axis=-1, keepdims=True)
    shifted = logits - m
    lse = jnp.log(jnp.sum(jnp.exp(shifted), axis=-1, keepdims=True))
    out_ref[...] = (shifted - lse).astype(out_ref.dtype)


def _round_up(v, m):
    return ((v + m - 1) // m) * m


def _choose_tile(batch, image_size, tb):
    # Cap the f32 x block around 4 MiB so the double-buffered input stays well
    # inside default scoped-VMEM limits on v5e/v6e/v7x even for image_size=784.
    vmem_cap = max(16, (((4 << 20) // (image_size * 4)) // 16) * 16)
    tile_b = min(tb, vmem_cap, _round_up(batch, 16))
    if batch >= 32:
        # Keep >= 2 grid blocks so ("parallel",) can shard across v7x's 2 TCs.
        tile_b = min(tile_b, _round_up(pl.cdiv(batch, 2), 16))
    return max(16, tile_b)


def neural_network_e_forward(x, params, *, tb=4096):
    """x: (B, C, H, W) or (B, image_size); params: list of (W, b) with W (in, out)."""
    image_size = params[0][0].shape[0]
    x2d = x.reshape(-1, image_size).astype(jnp.float32)
    B = x2d.shape[0]

    tile_b = _choose_tile(B, image_size, tb)
    n_blocks = pl.cdiv(B, tile_b)

    flat_params = []
    in_specs = [pl.BlockSpec((tile_b, image_size), lambda i: (i, 0))]
    for w, b in params:
        flat_params.append(w.astype(jnp.bfloat16))          # tiny, one-time cast
        flat_params.append(b.reshape(1, -1).astype(jnp.float32))
        # Weights/biases: full-array blocks, constant index_map -> resident in
        # VMEM, never re-DMA'd across batch tiles.
        in_specs.append(pl.BlockSpec(w.shape, lambda i: (0, 0)))
        in_specs.append(pl.BlockSpec((1, b.shape[0]), lambda i: (0, 0)))

    # Ragged last block: out-of-bounds input rows are garbage but rows are
    # independent (matmul + per-row softmax), and out-of-bounds output rows are
    # discarded by Pallas, so no batch padding pass is needed.
    out = pl.pallas_call(
        mlp_kernel,
        out_shape=jax.ShapeDtypeStruct((B, 10), jnp.float32),
        grid=(n_blocks,),
        in_specs=in_specs,
        out_specs=pl.BlockSpec((tile_b, 10), lambda i: (i, 0)),
        compiler_params=pltpu.CompilerParams(
            dimension_semantics=("parallel",)),
    )(x2d, *flat_params)
    return out


def init_params(key, image_size):
    """Deterministic init matching nn.Linear default (U[-1/sqrt(fan_in), 1/sqrt(fan_in)]).
    Weights stored as (in_features, out_features)."""
    dims = [image_size, 128, 64, 10, 10, 10, 10]
    params = []
    for i in range(len(dims) - 1):
        fan_in, fan_out = dims[i], dims[i + 1]
        key, kw, kb = jax.random.split(key, 3)
        bound = 1.0 / jnp.sqrt(jnp.float32(fan_in))
        w = jax.random.uniform(kw, (fan_in, fan_out), jnp.float32, -bound, bound)
        b = jax.random.uniform(kb, (fan_out,), jnp.float32, -bound, bound)
        params.append((w, b))
    return params


def reference_forward(x, params):
    """Pure-JAX f32 reference matching the PyTorch module."""
    h = x.reshape(x.shape[0], -1).astype(jnp.float32)
    n = len(params)
    for i, (w, b) in enumerate(params):
        h = h @ w + b
        if i < n - 1:
            h = jax.nn.sigmoid(h)
    return jax.nn.log_softmax(h, axis=-1)


if __name__ == "__main__":
    key = jax.random.PRNGKey(0)
    kx, kp = jax.random.split(key)

    # Small MNIST-like input: batch=2, 1 channel, 16x16 image -> image_size=256.
    B, C, H, W = 2, 1, 16, 16
    image_size = C * H * W
    x = jax.random.normal(kx, (B, C, H, W), jnp.float32)

    params = init_params(kp, image_size)

    out = neural_network_e_forward(x, params)
    out = jax.block_until_ready(out)

    assert out.shape == (B, 10)

    # sanity: log_softmax rows should exponentiate-sum to ~1 (f32 softmax).
    row_sums = jnp.sum(jnp.exp(out), axis=-1)
    assert bool(jnp.all(jnp.abs(row_sums - 1.0) < 1e-3))

    # correctness vs. f32 reference (loose tolerance: bf16 MXU/activation path).
    ref = reference_forward(x, params)
    max_err = float(jnp.max(jnp.abs(out - ref)))
    assert max_err < 1e-1, f"max abs error vs reference too large: {max_err}"

    print("KERNEL_OK")
</pallas_src>

<mosaic_0001>
module attributes {stable_mosaic.version = 11 : i64} {
  func.func @mlp_kernel(%arg0: i32, %arg1: memref<16x256xf32, #tpu.memory_space<vmem>>, %arg2: memref<256x128xbf16, #tpu.memory_space<vmem>>, %arg3: memref<1x128xf32, #tpu.memory_space<vmem>>, %arg4: memref<128x64xbf16, #tpu.memory_space<vmem>>, %arg5: memref<1x64xf32, #tpu.memory_space<vmem>>, %arg6: memref<64x10xbf16, #tpu.memory_space<vmem>>, %arg7: memref<1x10xf32, #tpu.memory_space<vmem>>, %arg8: memref<10x10xbf16, #tpu.memory_space<vmem>>, %arg9: memref<1x10xf32, #tpu.memory_space<vmem>>, %arg10: memref<10x10xbf16, #tpu.memory_space<vmem>>, %arg11: memref<1x10xf32, #tpu.memory_space<vmem>>, %arg12: memref<10x10xbf16, #tpu.memory_space<vmem>>, %arg13: memref<1x10xf32, #tpu.memory_space<vmem>>, %arg14: memref<16x10xf32, #tpu.memory_space<vmem>>) attributes {dimension_semantics = [#tpu.dimension_semantics<parallel>], iteration_bounds = array<i64: 1>, scalar_prefetch = 0 : i64, scratch_operands = 0 : i64, tpu.core_type = #tpu.core_type<tc>, window_params = [{transform_indices = @transform_0, window_bounds = array<i64: 16, 256>}, {pipeline_mode = #tpu.pipeline_mode<synchronous>, transform_indices = @transform_1, window_bounds = array<i64: 256, 128>}, {pipeline_mode = #tpu.pipeline_mode<synchronous>, transform_indices = @transform_2, window_bounds = array<i64: 1, 128>}, {pipeline_mode = #tpu.pipeline_mode<synchronous>, transform_indices = @transform_3, window_bounds = array<i64: 128, 64>}, {pipeline_mode = #tpu.pipeline_mode<synchronous>, transform_indices = @transform_4, window_bounds = array<i64: 1, 64>}, {pipeline_mode = #tpu.pipeline_mode<synchronous>, transform_indices = @transform_5, window_bounds = array<i64: 64, 10>}, {pipeline_mode = #tpu.pipeline_mode<synchronous>, transform_indices = @transform_6, window_bounds = array<i64: 1, 10>}, {pipeline_mode = #tpu.pipeline_mode<synchronous>, transform_indices = @transform_7, window_bounds = array<i64: 10, 10>}, {pipeline_mode = #tpu.pipeline_mode<synchronous>, transform_indices = @transform_8, window_bounds = array<i64: 1, 10>}, {pipeline_mode = #tpu.pipeline_mode<synchronous>, transform_indices = @transform_9, window_bounds = array<i64: 10, 10>}, {pipeline_mode = #tpu.pipeline_mode<synchronous>, transform_indices = @transform_10, window_bounds = array<i64: 1, 10>}, {pipeline_mode = #tpu.pipeline_mode<synchronous>, transform_indices = @transform_11, window_bounds = array<i64: 10, 10>}, {pipeline_mode = #tpu.pipeline_mode<synchronous>, transform_indices = @transform_12, window_bounds = array<i64: 1, 10>}, {transform_indices = @transform_13, window_bounds = array<i64: 16, 10>}]} {
    %c0 = arith.constant 0 : index
    %c0_0 = arith.constant 0 : index
    %0 = vector.load %arg1[%c0, %c0_0] : memref<16x256xf32, #tpu.memory_space<vmem>>, vector<16x256xf32>
    %1 = arith.truncf %0 : vector<16x256xf32> to vector<16x256xbf16>
    %c0_1 = arith.constant 0 : index
    %c0_2 = arith.constant 0 : index
    %2 = vector.load %arg2[%c0_1, %c0_2] : memref<256x128xbf16, #tpu.memory_space<vmem>>, vector<256x128xbf16>
    %cst = arith.constant dense<0.000000e+00> : vector<16x128xf32>
    %3 = tpu.matmul %1, %2, %cst {dimension_numbers = #tpu.dot_dimension_numbers<[1], [0], [0], [1], [0, 0, 1, 1], [], []>} : vector<16x256xbf16>, vector<256x128xbf16>, vector<16x128xf32> -> vector<16x128xf32>
    %c0_3 = arith.constant 0 : index
    %c0_4 = arith.constant 0 : index
    %4 = vector.load %arg3[%c0_3, %c0_4] : memref<1x128xf32, #tpu.memory_space<vmem>>, vector<1x128xf32>
    %5 = vector.broadcast %4 : vector<1x128xf32> to vector<16x128xf32>
    %6 = arith.addf %3, %5 : vector<16x128xf32>
    %7 = arith.truncf %6 : vector<16x128xf32> to vector<16x128xbf16>
    %cst_5 = arith.constant 5.000000e-01 : bf16
    %8 = vector.broadcast %cst_5 : bf16 to vector<16x128xbf16>
    %9 = arith.mulf %7, %8 : vector<16x128xbf16>
    %10 = math.tanh %9 : vector<16x128xbf16>
    %cst_6 = arith.constant 5.000000e-01 : bf16
    %11 = vector.broadcast %cst_6 : bf16 to vector<16x128xbf16>
    %12 = arith.mulf %10, %11 : vector<16x128xbf16>
    %cst_7 = arith.constant 5.000000e-01 : bf16
    %13 = vector.broadcast %cst_7 : bf16 to vector<16x128xbf16>
    %14 = arith.addf %12, %13 : vector<16x128xbf16>
    %c0_8 = arith.constant 0 : index
    %c0_9 = arith.constant 0 : index
    %15 = vector.load %arg4[%c0_8, %c0_9] : memref<128x64xbf16, #tpu.memory_space<vmem>>, vector<128x64xbf16>
    %cst_10 = arith.constant dense<0.000000e+00> : vector<16x64xf32>
    %16 = tpu.matmul %14, %15, %cst_10 {dimension_numbers = #tpu.dot_dimension_numbers<[1], [0], [0], [1], [0, 0, 1, 1], [], []>} : vector<16x128xbf16>, vector<128x64xbf16>, vector<16x64xf32> -> vector<16x64xf32>
    %c0_11 = arith.constant 0 : index
    %c0_12 = arith.constant 0 : index
    %17 = vector.load %arg5[%c0_11, %c0_12] : memref<1x64xf32, #tpu.memory_space<vmem>>, vector<1x64xf32>
    %18 = vector.broadcast %17 : vector<1x64xf32> to vector<16x64xf32>
    %19 = arith.addf %16, %18 : vector<16x64xf32>
    %20 = arith.truncf %19 : vector<16x64xf32> to vector<16x64xbf16>
    %cst_13 = arith.constant 5.000000e-01 : bf16
    %21 = vector.broadcast %cst_13 : bf16 to vector<16x64xbf16>
    %22 = arith.mulf %20, %21 : vector<16x64xbf16>
    %23 = math.tanh %22 : vector<16x64xbf16>
    %cst_14 = arith.constant 5.000000e-01 : bf16
    %24 = vector.broadcast %cst_14 : bf16 to vector<16x64xbf16>
    %25 = arith.mulf %23, %24 : vector<16x64xbf16>
    %cst_15 = arith.constant 5.000000e-01 : bf16
    %26 = vector.broadcast %cst_15 : bf16 to vector<16x64xbf16>
    %27 = arith.addf %25, %26 : vector<16x64xbf16>
    %c0_16 = arith.constant 0 : index
    %c0_17 = arith.constant 0 : index
    %28 = vector.load %arg6[%c0_16, %c0_17] : memref<64x10xbf16, #tpu.memory_space<vmem>>, vector<64x10xbf16>
    %cst_18 = arith.constant dense<0.000000e+00> : vector<16x10xf32>
    %29 = tpu.matmul %27, %28, %cst_18 {dimension_numbers = #tpu.dot_dimension_numbers<[1], [0], [0], [1], [0, 0, 1, 1], [], []>} : vector<16x64xbf16>, vector<64x10xbf16>, vector<16x10xf32> -> vector<16x10xf32>
    %c0_19 = arith.constant 0 : index
    %c0_20 = arith.constant 0 : index
    %30 = vector.load %arg7[%c0_19, %c0_20] : memref<1x10xf32, #tpu.memory_space<vmem>>, vector<1x10xf32>
    %31 = vector.broadcast %30 : vector<1x10xf32> to vector<16x10xf32>
    %32 = arith.addf %29, %31 : vector<16x10xf32>
    %33 = arith.truncf %32 : vector<16x10xf32> to vector<16x10xbf16>
    %cst_21 = arith.constant 5.000000e-01 : bf16
    %34 = vector.broadcast %cst_21 : bf16 to vector<16x10xbf16>
    %35 = arith.mulf %33, %34 : vector<16x10xbf16>
    %36 = math.tanh %35 : vector<16x10xbf16>
    %cst_22 = arith.constant 5.000000e-01 : bf16
    %37 = vector.broadcast %cst_22 : bf16 to vector<16x10xbf16>
    %38 = arith.mulf %36, %37 : vector<16x10xbf16>
    %cst_23 = arith.constant 5.000000e-01 : bf16
    %39 = vector.broadcast %cst_23 : bf16 to vector<16x10xbf16>
    %40 = arith.addf %38, %39 : vector<16x10xbf16>
    %c0_24 = arith.constant 0 : index
    %c0_25 = arith.constant 0 : index
    %41 = vector.load %arg8[%c0_24, %c0_25] : memref<10x10xbf16, #tpu.memory_space<vmem>>, vector<10x10xbf16>
    %cst_26 = arith.constant dense<0.000000e+00> : vector<16x10xf32>
    %42 = tpu.matmul %40, %41, %cst_26 {dimension_numbers = #tpu.dot_dimension_numbers<[1], [0], [0], [1], [0, 0, 1, 1], [], []>} : vector<16x10xbf16>, vector<10x10xbf16>, vector<16x10xf32> -> vector<16x10xf32>
    %c0_27 = arith.constant 0 : index
    %c0_28 = arith.constant 0 : index
    %43 = vector.load %arg9[%c0_27, %c0_28] : memref<1x10xf32, #tpu.memory_space<vmem>>, vector<1x10xf32>
    %44 = vector.broadcast %43 : vector<1x10xf32> to vector<16x10xf32>
    %45 = arith.addf %42, %44 : vector<16x10xf32>
    %46 = arith.truncf %45 : vector<16x10xf32> to vector<16x10xbf16>
    %cst_29 = arith.constant 5.000000e-01 : bf16
    %47 = vector.broadcast %cst_29 : bf16 to vector<16x10xbf16>
    %48 = arith.mulf %46, %47 : vector<16x10xbf16>
    %49 = math.tanh %48 : vector<16x10xbf16>
    %cst_30 = arith.constant 5.000000e-01 : bf16
    %50 = vector.broadcast %cst_30 : bf16 to vector<16x10xbf16>
    %51 = arith.mulf %49, %50 : vector<16x10xbf16>
    %cst_31 = arith.constant 5.000000e-01 : bf16
    %52 = vector.broadcast %cst_31 : bf16 to vector<16x10xbf16>
    %53 = arith.addf %51, %52 : vector<16x10xbf16>
    %c0_32 = arith.constant 0 : index
    %c0_33 = arith.constant 0 : index
    %54 = vector.load %arg10[%c0_32, %c0_33] : memref<10x10xbf16, #tpu.memory_space<vmem>>, vector<10x10xbf16>
    %cst_34 = arith.constant dense<0.000000e+00> : vector<16x10xf32>
    %55 = tpu.matmul %53, %54, %cst_34 {dimension_numbers = #tpu.dot_dimension_numbers<[1], [0], [0], [1], [0, 0, 1, 1], [], []>} : vector<16x10xbf16>, vector<10x10xbf16>, vector<16x10xf32> -> vector<16x10xf32>
    %c0_35 = arith.constant 0 : index
    %c0_36 = arith.constant 0 : index
    %56 = vector.load %arg11[%c0_35, %c0_36] : memref<1x10xf32, #tpu.memory_space<vmem>>, vector<1x10xf32>
    %57 = vector.broadcast %56 : vector<1x10xf32> to vector<16x10xf32>
    %58 = arith.addf %55, %57 : vector<16x10xf32>
    %59 = arith.truncf %58 : vector<16x10xf32> to vector<16x10xbf16>
    %cst_37 = arith.constant 5.000000e-01 : bf16
    %60 = vector.broadcast %cst_37 : bf16 to vector<16x10xbf16>
    %61 = arith.mulf %59, %60 : vector<16x10xbf16>
    %62 = math.tanh %61 : vector<16x10xbf16>
    %cst_38 = arith.constant 5.000000e-01 : bf16
    %63 = vector.broadcast %cst_38 : bf16 to vector<16x10xbf16>
    %64 = arith.mulf %62, %63 : vector<16x10xbf16>
    %cst_39 = arith.constant 5.000000e-01 : bf16
    %65 = vector.broadcast %cst_39 : bf16 to vector<16x10xbf16>
    %66 = arith.addf %64, %65 : vector<16x10xbf16>
    %c0_40 = arith.constant 0 : index
    %c0_41 = arith.constant 0 : index
    %67 = vector.load %arg12[%c0_40, %c0_41] : memref<10x10xbf16, #tpu.memory_space<vmem>>, vector<10x10xbf16>
    %cst_42 = arith.constant dense<0.000000e+00> : vector<16x10xf32>
    %68 = tpu.matmul %66, %67, %cst_42 {dimension_numbers = #tpu.dot_dimension_numbers<[1], [0], [0], [1], [0, 0, 1, 1], [], []>} : vector<16x10xbf16>, vector<10x10xbf16>, vector<16x10xf32> -> vector<16x10xf32>
    %c0_43 = arith.constant 0 : index
    %c0_44 = arith.constant 0 : index
    %69 = vector.load %arg13[%c0_43, %c0_44] : memref<1x10xf32, #tpu.memory_space<vmem>>, vector<1x10xf32>
    %70 = vector.broadcast %69 : vector<1x10xf32> to vector<16x10xf32>
    %71 = arith.addf %68, %70 : vector<16x10xf32>
    %cst_45 = arith.constant dense<0xFF800000> : vector<16xf32>
    %72 = vector.multi_reduction <maximumf>, %71, %cst_45 [1] : vector<16x10xf32> to vector<16xf32>
    %73 = vector.shape_cast %72 : vector<16xf32> to vector<16x1xf32>
    %74 = vector.broadcast %73 : vector<16x1xf32> to vector<16x10xf32>
    %75 = arith.subf %71, %74 : vector<16x10xf32>
    %76 = math.exp %75 : vector<16x10xf32>
    %cst_46 = arith.constant dense<0.000000e+00> : vector<16xf32>
    %77 = vector.multi_reduction <add>, %76, %cst_46 [1] : vector<16x10xf32> to vector<16xf32>
    %78 = vector.shape_cast %77 : vector<16xf32> to vector<16x1xf32>
    %79 = math.log %78 : vector<16x1xf32>
    %80 = vector.broadcast %79 : vector<16x1xf32> to vector<16x10xf32>
    %81 = arith.subf %75, %80 : vector<16x10xf32>
    %c0_47 = arith.constant 0 : index
    %c0_48 = arith.constant 0 : index
    %82 = vector.load %arg14[%c0_47, %c0_48] : memref<16x10xf32, #tpu.memory_space<vmem>>, vector<16x10xf32>
    tpu.vector_store %arg14[%c0_47, %c0_48], %81 {strides = array<i32>} : memref<16x10xf32, #tpu.memory_space<vmem>>, vector<16x10xf32>,
    return
  }
  func.func @transform_0(%arg0: i32) -> (i32, i32) {
    %c0_i32 = arith.constant 0 : i32
    %c0_i32_0 = arith.constant 0 : i32
    return %arg0, %c0_i32 : i32, i32
  }
  func.func @transform_1(%arg0: i32) -> (i32, i32) {
    %c0_i32 = arith.constant 0 : i32
    %c0_i32_0 = arith.constant 0 : i32
    %c0_i32_1 = arith.constant 0 : i32
    return %c0_i32, %c0_i32_0 : i32, i32
  }
  func.func @transform_2(%arg0: i32) -> (i32, i32) {
    %c0_i32 = arith.constant 0 : i32
    %c0_i32_0 = arith.constant 0 : i32
    %c0_i32_1 = arith.constant 0 : i32
    return %c0_i32, %c0_i32_0 : i32, i32
  }
  func.func @transform_3(%arg0: i32) -> (i32, i32) {
    %c0_i32 = arith.constant 0 : i32
    %c0_i32_0 = arith.constant 0 : i32
    %c0_i32_1 = arith.constant 0 : i32
    return %c0_i32, %c0_i32_0 : i32, i32
  }
  func.func @transform_4(%arg0: i32) -> (i32, i32) {
    %c0_i32 = arith.constant 0 : i32
    %c0_i32_0 = arith.constant 0 : i32
    %c0_i32_1 = arith.constant 0 : i32
    return %c0_i32, %c0_i32_0 : i32, i32
  }
  func.func @transform_5(%arg0: i32) -> (i32, i32) {
    %c0_i32 = arith.constant 0 : i32
    %c0_i32_0 = arith.constant 0 : i32
    %c0_i32_1 = arith.constant 0 : i32
    return %c0_i32, %c0_i32_0 : i32, i32
  }
  func.func @transform_6(%arg0: i32) -> (i32, i32) {
    %c0_i32 = arith.constant 0 : i32
    %c0_i32_0 = arith.constant 0 : i32
    %c0_i32_1 = arith.constant 0 : i32
    return %c0_i32, %c0_i32_0 : i32, i32
  }
  func.func @transform_7(%arg0: i32) -> (i32, i32) {
    %c0_i32 = arith.constant 0 : i32
    %c0_i32_0 = arith.constant 0 : i32
    %c0_i32_1 = arith.constant 0 : i32
    return %c0_i32, %c0_i32_0 : i32, i32
  }
  func.func @transform_8(%arg0: i32) -> (i32, i32) {
    %c0_i32 = arith.constant 0 : i32
    %c0_i32_0 = arith.constant 0 : i32
    %c0_i32_1 = arith.constant 0 : i32
    return %c0_i32, %c0_i32_0 : i32, i32
  }
  func.func @transform_9(%arg0: i32) -> (i32, i32) {
    %c0_i32 = arith.constant 0 : i32
    %c0_i32_0 = arith.constant 0 : i32
    %c0_i32_1 = arith.constant 0 : i32
    return %c0_i32, %c0_i32_0 : i32, i32
  }
  func.func @transform_10(%arg0: i32) -> (i32, i32) {
    %c0_i32 = arith.constant 0 : i32
    %c0_i32_0 = arith.constant 0 : i32
    %c0_i32_1 = arith.constant 0 : i32
    return %c0_i32, %c0_i32_0 : i32, i32
  }
  func.func @transform_11(%arg0: i32) -> (i32, i32) {
    %c0_i32 = arith.constant 0 : i32
    %c0_i32_0 = arith.constant 0 : i32
    %c0_i32_1 = arith.constant 0 : i32
    return %c0_i32, %c0_i32_0 : i32, i32
  }
  func.func @transform_12(%arg0: i32) -> (i32, i32) {
    %c0_i32 = arith.constant 0 : i32
    %c0_i32_0 = arith.constant 0 : i32
    %c0_i32_1 = arith.constant 0 : i32
    return %c0_i32, %c0_i32_0 : i32, i32
  }
  func.func @transform_13(%arg0: i32) -> (i32, i32) {
    %c0_i32 = arith.constant 0 : i32
    %c0_i32_0 = arith.constant 0 : i32
    return %arg0, %c0_i32 : i32, i32
  }
}

</mosaic_0001>

<bundles_post_ra>
// kernel: tpu_custom_call.1
= control target key start
LH: loop header
LB: loop body
LE: loop exit
PB: predicated region body
PF: predicated region fallthrough
CT: control target
= control target key end

     0   :  { %18 = vsyncpa [#allocation3], 0  ;;  %s1105_s0 = inlined_call_operand.vmem [shape: f32[2,256], index: 0, kind: input, shape index: {}]   ;;  %s1106_s1 = inlined_call_operand.hbm [shape: bf16[256,128], index: 1, kind: input, shape index: {}]   ;;  %s1107_s2 = inlined_call_operand.vmem [shape: f32[1,128], index: 2, kind: input, shape index: {}]   ;;  %s1108_s3 = inlined_call_operand.vmem [shape: bf16[128,64], index: 3, kind: input, shape index: {}]   ;;  %s1109_s4 = inlined_call_operand.vmem [shape: f32[1,64], index: 4, kind: input, shape index: {}]   ;;  %s1110_s5 = inlined_call_operand.vmem [shape: bf16[64,10], index: 5, kind: input, shape index: {}]   ;;  %s1111_s6 = inlined_call_operand.vmem [shape: f32[1,10], index: 6, kind: input, shape index: {}]   ;;  %s1112_s7 = inlined_call_operand.vmem [shape: bf16[10,10], index: 7, kind: input, shape index: {}]   ;;  %s1113_s8 = inlined_call_operand.vmem [shape: f32[1,10], index: 8, kind: input, shape index: {}]   ;;  %s1114_s9 = inlined_call_operand.vmem [shape: bf16[10,10], index: 9, kind: input, shape index: {}]   ;;  %s1115_s10 = inlined_call_operand.vmem [shape: f32[1,10], index: 10, kind: input, shape index: {}]   ;;  %s1116_s11 = inlined_call_operand.vmem [shape: bf16[10,10], index: 11, kind: input, shape index: {}]   ;;  %s1117_s12 = inlined_call_operand.vmem [shape: f32[1,10], index: 12, kind: input, shape index: {}]   ;;  %s1118_s13 = inlined_call_operand.hbm [shape: f32[2,10], index: 13, kind: output, shape index: {}]  }
   0x1   :  { %19 = vsyncpa [#allocation4], 0  ;;  %s26_s27 = sshll.u32 %s1106_s1, 4  ;;  %s915_s28 = smov [#allocation2]   ;;  %s27_s27 = int_to_ptr.hbm [resolvable:$true] %s26_s27 }
   0x2   :  { %s28_s29 = sshll.u32 %s915_s28, 4  ;;  %s916_s30 = smov 64   ;;  %s29_s29 = int_to_ptr.vmem [resolvable:$true] %s28_s29 }
   0x3   :  { %s917_s14 = smov 4  }
   0x4   :  { %34 = dma.hbm_to_vmem [thread:$0]  %s27_s27, 2048, %s29_s29, [#allocation3], %s916_s30, %s916_s30, %s917_s14  }
   0x5   :  { %911 = dma.done.wait [#allocation3], 2048  }
   0x6   :  { %912 = vsyncadd [#allocation3], 4294965248  ;;  %v799_v0 = vld [vmem:[#allocation2 + $0x38] sm:$0xff]  ;;  %v798_v2 = vld [vmem:[#allocation2 + $0x30] sm:$0xff]  ;;  %vm431_vm0 = vcmask 523264   ;;  %vm489_vm1 = vcmask 1044480  }
   0x7   :  { %v807_v1 = vld [vmem:[#allocation2 + $0x78] sm:$0xff]  ;;  %235 = vmatpush.bf16.msra.mxu0 %v799_v0  ;;  %v806_v3 = vld [vmem:[#allocation2 + $0x70] sm:$0xff]  ;;  %v797_v5 = vld [vmem:[#allocation2 + $0x28] sm:$0xff]  ;;  %vm485_vm2 = vcmask 80896  }
   0x8   :  { %249 = vmatpush.bf16.msra.mxu1 %v807_v1  ;;  %v62_v4 = vld [vmem:[%s1105_s0] sm:$0xf]  ;;  %v805_v6 = vld [vmem:[#allocation2 + $0x68] sm:$0xff]  ;;  %v63_v7 = vld [vmem:[%s1105_s0 + $0x4] sm:$0xf] }
   0x9   :  { %v64_v8 = vld [vmem:[%s1105_s0 + $0x8] sm:$0xf]  ;;  %v65_v9 = vld [vmem:[%s1105_s0 + $0xc] sm:$0xf]  ;;  %v66_v10 = vld [vmem:[%s1105_s0 + $0x10] sm:$0xf] }
   0xa   :  { %v796_v11 = vld [vmem:[#allocation2 + $0x20] sm:$0xff]  ;;  %v67_v13 = vld [vmem:[%s1105_s0 + $0x14] sm:$0xf]  ;;  %78 = vst [vmem:[#allocation1] ss:$4 sm:$0xff] %v62_v4  ;;  %v795_v16 = vld [vmem:[#allocation2 + $0x18] sm:$0xff] }
   0xb   :  { %236 = vmatpush.bf16.msra.mxu0 %v798_v2  ;;  %v804_v12 = vld [vmem:[#allocation2 + $0x60] sm:$0xff]  ;;  %80 = vst [vmem:[#allocation1 + $0x1] ss:$4 sm:$0xff] %v63_v7  ;;  %v68_v14 = vld [vmem:[%s1105_s0 + $0x18] sm:$0xf]  ;;  %v803_v17 = vld [vmem:[#allocation2 + $0x58] sm:$0xff] }
   0xc   :  { %250 = vmatpush.bf16.msra.mxu1 %v806_v3  ;;  %82 = vst [vmem:[#allocation1 + $0x2] ss:$4 sm:$0xff] %v64_v8  ;;  %v69_v15 = vld [vmem:[%s1105_s0 + $0x1c] sm:$0xf]  ;;  %v793_v20 = vld [vmem:[#allocation2 + $0x8] sm:$0xff]  ;;  %v792_v22 = vld [vmem:[#allocation2] sm:$0xff] }
   0xd   :  { %84 = vst [vmem:[#allocation1 + $0x3] ss:$4 sm:$0xff] %v65_v9  ;;  %v794_v18 = vld [vmem:[#allocation2 + $0x10] sm:$0xff]  ;;  %v801_v21 = vld [vmem:[#allocation2 + $0x48] sm:$0xff]  ;;  %v800_v23 = vld [vmem:[#allocation2 + $0x40] sm:$0xff] }
   0xe   :  { %86 = vst [vmem:[#allocation1 + $0x20] ss:$4 sm:$0xff] %v66_v10  ;;  %v802_v19 = vld [vmem:[#allocation2 + $0x50] sm:$0xff]  ;;  %v814_v31 = vld [vmem:[%s1108_s3 + $0x30] sm:$0xff]  ;;  %v813_v32 = vld [vmem:[%s1108_s3 + $0x28] sm:$0xff] }
   0xf   :  { %237 = vmatpush.bf16.msra.mxu0 %v797_v5  ;;  %88 = vst [vmem:[#allocation1 + $0x21] ss:$4 sm:$0xff] %v67_v13  ;;  %v815_v30 = vld [vmem:[%s1108_s3 + $0x38] sm:$0xff]  ;;  %v812_v33 = vld [vmem:[%s1108_s3 + $0x20] sm:$0xff]  ;;  %v810_v36 = vld [vmem:[%s1108_s3 + $0x10] sm:$0xff] }
  0x10   :  { %251 = vmatpush.bf16.msra.mxu1 %v805_v6  ;;  %90 = vst [vmem:[#allocation1 + $0x22] ss:$4 sm:$0xff] %v68_v14  ;;  %356 = vmatpush.bf16.msra.mxu2 %v815_v30  ;;  %v811_v34 = vld [vmem:[%s1108_s3 + $0x18] sm:$0xff]  ;;  %v829_v35 = vld [vmem:[%s1107_s2] ss:$0 sm:$0xff]  ;;  %v809_v40 = vld [vmem:[%s1108_s3 + $0x8] sm:$0xff] }
  0x11   :  { %92 = vst [vmem:[#allocation1 + $0x23] ss:$4 sm:$0xff] %v69_v15  ;;  %v808_v43 = vld [vmem:[%s1108_s3] sm:$0xff]  ;;  %v819_v8 = vld [vmem:[%s1110_s5 + $0x18] sm:$0xff]  ;;  %v818_v10 = vld [vmem:[%s1110_s5 + $0x10] sm:$0xff] }
  0x12   :  { %439 = vmatpush.bf16.msra.mxu3 %v819_v8  ;;  %v830_v9 = vld [vmem:[%s1109_s4] ss:$0 sm:$0xff]  ;;  %v817_v13 = vld [vmem:[%s1110_s5 + $0x8] sm:$0xff] }
  0x13   :  { %238 = vmatpush.bf16.msra.mxu0 %v796_v11  ;;  %v816_v15 = vld [vmem:[%s1110_s5] sm:$0xff] }
  0x14   :  { %252 = vmatpush.bf16.msra.mxu1 %v804_v12  ;;  %v93_v24 = vld.sshfl [vmem:[#allocation1] sm:$0xff pattern:$0x73625140]  ;;  %v94_v25 = vld.sshfl [vmem:[#allocation1 + $0x8] sm:$0xff pattern:$0x73625140]  ;;  %357 = vmatpush.bf16.msra.mxu2 %v814_v31 }
  0x16   :  { %440 = vmatpush.bf16.msra.mxu3 %v818_v10 }
  0x17   :  { %239 = vmatpush.bf16.msra.mxu0 %v795_v16 }
  0x18   :  { %253 = vmatpush.bf16.msra.mxu1 %v803_v17  ;;  %v95_v26 = vld.sshfl [vmem:[#allocation1 + $0x20] sm:$0xff pattern:$0x73625140]  ;;  %v96_v27 = vld.sshfl [vmem:[#allocation1 + $0x28] sm:$0xff pattern:$0x73625140]  ;;  %358 = vmatpush.bf16.msra.mxu2 %v813_v32 }
  0x19   :  { %v101_v28 = vpack.c.bf16 %v95_v26, %v93_v24  ;;  %v102_v29 = vpack.c.bf16 %v96_v27, %v94_v25 }
  0x1a   :  { %441 = vmatpush.bf16.msra.mxu3 %v817_v13 }
  0x1b   :  { %240 = vmatpush.bf16.msra.mxu0 %v794_v18 }
  0x1c   :  { %254 = vmatpush.bf16.msra.mxu1 %v802_v19  ;;  %359 = vmatpush.bf16.msra.mxu2 %v812_v33 }
  0x1e   :  { %442 = vmatpush.bf16.msra.mxu3 %v816_v15 }
  0x1f   :  { %241 = vmatpush.bf16.msra.mxu0 %v793_v20 }
  0x20   :  { %255 = vmatpush.bf16.msra.mxu1 %v801_v21  ;;  %360 = vmatpush.bf16.msra.mxu2 %v811_v34 }
  0x23   :  { %242 = vmatpush.bf16.msra.mxu0 %v792_v22 }
  0x24   :  { %256 = vmatpush.bf16.msra.mxu1 %v800_v23  ;;  %361 = vmatpush.bf16.msra.mxu2 %v810_v36 }
  0x26   :  { %243 = vmatmul.bf16.vlgmr.msra.gmra.mxu0 %v101_v28 }
  0x27   :  { %257 = vmatmul.bf16.vlgmr.msra.gmra.mxu1 %v102_v29 }
  0x28   :  { %362 = vmatpush.bf16.msra.mxu2 %v809_v40 }
  0x2c   :  { %363 = vmatpush.bf16.msra.mxu2 %v808_v43 }
  0xa3   :  { %v244_v37 = vpop.f32.mrf.mxu0 }
  0xa4   :  { %v258_v38 = vpop.f32.mrf.mxu1  ;;  %v245_v39 = vadd.f32 %v829_v35, %v244_v37 }
  0xa6   :  { %v259_v41 = vadd.f32 %v258_v38, %v245_v39 }
  0xa8   :  { %v263_v42 = vpack.c.bf16 %v259_v41, %v259_v41 }
  0xaa   :  { %v265_v44 = vunpack.c.l.bf16 %v263_v42  ;;  %v831_v42 = vld [vmem:[%s1111_s6] ss:$0 sm:$0xff] }
  0xab   :  { %v246_v45 = vpop.f32.mrf.mxu0 }
  0xac   :  { %v267_v46 = vmul.f32 0.5, %v265_v44  ;;  %v247_v47 = vadd.f32 %v829_v35, %v246_v45  ;;  %v260_v48 = vpop.f32.mrf.mxu1 }
  0xae   :  { %v269_v49 = vpack.c.bf16 %v267_v46, %v267_v46  ;;  %v261_v50 = vadd.f32 %v260_v48, %v247_v47  ;;  %v779_v46 = vld [vmem:[%s1112_s7] sm:$0xf]  ;;  %v820_v47 = vld [vmem:[%s1112_s7] sm:$0x10] }
  0xaf   :  { %v780_v48 = vor.u32 %v820_v47, %v779_v46  ;;  %v833_v46 = vld [vmem:[%s1115_s10] ss:$0 sm:$0xff] }
  0xb0   :  { %v271_v51 = vunpack.c.l.bf16 %v269_v49  ;;  %v264_v52 = vpack.c.bf16 %v261_v50, %v261_v50 }
  0xb1   :  { %v491_v50 = vsel %vm489_vm1, %v780_v48, 0 }
  0xb2   :  { %835 = vtanh.f32 %v271_v51  ;;  %v266_v53 = vunpack.c.l.bf16 %v264_v52  ;;  %500 = vmatpush.bf16.msrb.mxu3 %v491_v50  ;;  %v789_v50 = vld [vmem:[%s1116_s11] sm:$0xf] }
  0xb4   :  { %v268_v54 = vmul.f32 0.5, %v266_v53 }
  0xb6   :  { %v270_v55 = vpack.c.bf16 %v268_v54, %v268_v54 }
  0xb8   :  { %v836_v56 = vpop.eup %835  ;;  %v272_v57 = vunpack.c.l.bf16 %v270_v55 }
  0xb9   :  { %v275_v58 = vpack.c.bf16 %v836_v56, %v836_v56 }
  0xba   :  { %837 = vtanh.f32 %v272_v57 }
  0xbb   :  { %v277_v59 = vunpack.c.l.bf16 %v275_v58 }
  0xbd   :  { %v279_v60 = vmul.f32 0.5, %v277_v59 }
  0xbf   :  { %v281_v0 = vpack.c.bf16 %v279_v60, %v279_v60 }
  0xc0   :  { %v838_v61 = vpop.eup %837 }
  0xc1   :  { %v276_v62 = vpack.c.bf16 %v838_v61, %v838_v61  ;;  %v283_v3 = vunpack.c.l.bf16 %v281_v0 }
  0xc3   :  { %v278_v63 = vunpack.c.l.bf16 %v276_v62  ;;  %v285_v5 = vadd.f32 0.5, %v283_v3 }
  0xc5   :  { %v280_v1 = vmul.f32 0.5, %v278_v63 }
  0xc7   :  { %v282_v2 = vpack.c.bf16 %v280_v1, %v280_v1 }
  0xc9   :  { %v284_v4 = vunpack.c.l.bf16 %v282_v2 }
  0xcb   :  { %v286_v6 = vadd.f32 0.5, %v284_v4 }
  0xcd   :  { %v287_v7 = vpack.c.bf16 %v286_v6, %v285_v5 }
  0xcf   :  { %364 = vmatmul.bf16.vlgmr.msra.gmra.mxu2 %v287_v7 }
 0x152   :  { %v365_v11 = vpop.f32.mrf.mxu2 }
 0x153   :  { %v366_v12 = vadd.f32 %v830_v9, %v365_v11 }
 0x155   :  { %v370_v14 = vpack.c.bf16 %v366_v12, %v366_v12  ;;  %v832_v12 = vld [vmem:[%s1113_s8] ss:$0 sm:$0xff] }
 0x157   :  { %v372_v16 = vunpack.c.l.bf16 %v370_v14 }
 0x159   :  { %v374_v17 = vmul.f32 0.5, %v372_v16  ;;  %v784_v16 = vld [vmem:[%s1114_s9] sm:$0xf] }
 0x15a   :  { %v367_v18 = vpop.f32.mrf.mxu2 }
 0x15b   :  { %v376_v19 = vpack.c.bf16 %v374_v17, %v374_v17  ;;  %v368_v20 = vadd.f32 %v830_v9, %v367_v18  ;;  %v821_v17 = vld [vmem:[%s1114_s9] sm:$0x10] }
 0x15c   :  { %v785_v18 = vor.u32 %v821_v17, %v784_v16  ;;  %v834_v16 = vld [vmem:[%s1117_s12] ss:$0 sm:$0xff] }
 0x15d   :  { %v378_v21 = vunpack.c.l.bf16 %v376_v19  ;;  %v371_v22 = vpack.c.bf16 %v368_v20, %v368_v20 }
 0x15e   :  { %v547_v20 = vsel %vm489_vm1, %v785_v18, 0 }
 0x15f   :  { %839 = vtanh.f32 %v378_v21  ;;  %v373_v23 = vunpack.c.l.bf16 %v371_v22  ;;  %556 = vmatpush.bf16.msrb.mxu0 %v547_v20 }
 0x161   :  { %v375_v24 = vmul.f32 0.5, %v373_v23 }
 0x163   :  { %v377_v25 = vpack.c.bf16 %v375_v24, %v375_v24 }
 0x165   :  { %v840_v26 = vpop.eup %839  ;;  %v379_v27 = vunpack.c.l.bf16 %v377_v25 }
 0x166   :  { %v382_v28 = vpack.c.bf16 %v840_v26, %v840_v26 }
 0x167   :  { %841 = vtanh.f32 %v379_v27 }
 0x168   :  { %v384_v29 = vunpack.c.l.bf16 %v382_v28 }
 0x16a   :  { %v386_v30 = vmul.f32 0.5, %v384_v29 }
 0x16c   :  { %v388_v33 = vpack.c.bf16 %v386_v30, %v386_v30 }
 0x16d   :  { %v842_v31 = vpop.eup %841 }
 0x16e   :  { %v383_v32 = vpack.c.bf16 %v842_v31, %v842_v31  ;;  %v390_v37 = vunpack.c.l.bf16 %v388_v33 }
 0x170   :  { %v385_v34 = vunpack.c.l.bf16 %v383_v32  ;;  %v392_v39 = vadd.f32 0.5, %v390_v37 }
 0x172   :  { %v387_v35 = vmul.f32 0.5, %v385_v34 }
 0x174   :  { %v389_v36 = vpack.c.bf16 %v387_v35, %v387_v35 }
 0x176   :  { %v391_v38 = vunpack.c.l.bf16 %v389_v36 }
 0x178   :  { %v393_v40 = vadd.f32 0.5, %v391_v38 }
 0x17a   :  { %v394_v41 = vpack.c.bf16 %v393_v40, %v392_v39 }
 0x17c   :  { %776 = vmatmul.msk.bf16.vlgmr.msra.gmra.mxu3 %vm431_vm0, %v394_v41 }
 0x1ff   :  { %v444_v43 = vpop.f32.mrf.mxu3 }
 0x200   :  { %v445_v44 = vadd.f32 %v831_v42, %v444_v43 }
 0x202   :  { %v449_v45 = vpack.c.bf16 %v445_v44, %v445_v44 }
 0x204   :  { %v451_v49 = vunpack.c.l.bf16 %v449_v45 }
 0x206   :  { %v453_v51 = vmul.f32 0.5, %v451_v49 }
 0x207   :  { %v446_v52 = vpop.f32.mrf.mxu3 }
 0x208   :  { %v455_v53 = vpack.c.bf16 %v453_v51, %v453_v51  ;;  %v447_v54 = vadd.f32 %v831_v42, %v446_v52  ;;  %v822_v51 = vld [vmem:[%s1116_s11] sm:$0x10] }
 0x209   :  { %v790_v52 = vor.u32 %v822_v51, %v789_v50 }
 0x20a   :  { %v457_v55 = vunpack.c.l.bf16 %v455_v53  ;;  %v450_v56 = vpack.c.bf16 %v447_v54, %v447_v54 }
 0x20b   :  { %v603_v54 = vsel %vm489_vm1, %v790_v52, 0 }
 0x20c   :  { %843 = vtanh.f32 %v457_v55  ;;  %v452_v57 = vunpack.c.l.bf16 %v450_v56  ;;  %612 = vmatpush.bf16.msrb.mxu1 %v603_v54 }
 0x20e   :  { %v454_v58 = vmul.f32 0.5, %v452_v57 }
 0x210   :  { %v456_v59 = vpack.c.bf16 %v454_v58, %v454_v58 }
 0x212   :  { %v844_v60 = vpop.eup %843  ;;  %v458_v61 = vunpack.c.l.bf16 %v456_v59 }
 0x213   :  { %v461_v62 = vpack.c.bf16 %v844_v60, %v844_v60 }
 0x214   :  { %845 = vtanh.f32 %v458_v61 }
 0x215   :  { %v463_v63 = vunpack.c.l.bf16 %v461_v62 }
 0x217   :  { %v465_v0 = vmul.f32 0.5, %v463_v63 }
 0x219   :  { %v467_v3 = vpack.c.bf16 %v465_v0, %v465_v0 }
 0x21a   :  { %v846_v1 = vpop.eup %845 }
 0x21b   :  { %v462_v2 = vpack.c.bf16 %v846_v1, %v846_v1  ;;  %v469_v6 = vunpack.c.l.bf16 %v467_v3 }
 0x21d   :  { %v464_v4 = vunpack.c.l.bf16 %v462_v2  ;;  %v471_v9 = vadd.f32 0.5, %v469_v6 }
 0x21f   :  { %v466_v5 = vmul.f32 0.5, %v464_v4 }
 0x221   :  { %v468_v7 = vpack.c.bf16 %v466_v5, %v466_v5 }
 0x223   :  { %v470_v8 = vunpack.c.l.bf16 %v468_v7 }
 0x225   :  { %v472_v10 = vadd.f32 0.5, %v470_v8 }
 0x227   :  { %v473_v11 = vpack.c.bf16 %v472_v10, %v471_v9 }
 0x229   :  { %781 = vmatmul.msk.bf16.vlgmr.msrb.gmra.mxu3 %vm485_vm2, %v473_v11 }
 0x2ac   :  { %v502_v13 = vpop.f32.mrf.mxu3 }
 0x2ad   :  { %v503_v14 = vadd.f32 %v832_v12, %v502_v13 }
 0x2af   :  { %v507_v15 = vpack.c.bf16 %v503_v14, %v503_v14 }
 0x2b1   :  { %v509_v19 = vunpack.c.l.bf16 %v507_v15 }
 0x2b3   :  { %v511_v21 = vmul.f32 0.5, %v509_v19 }
 0x2b4   :  { %v504_v22 = vpop.f32.mrf.mxu3 }
 0x2b5   :  { %v513_v23 = vpack.c.bf16 %v511_v21, %v511_v21  ;;  %v505_v24 = vadd.f32 %v832_v12, %v504_v22 }
 0x2b7   :  { %v515_v25 = vunpack.c.l.bf16 %v513_v23  ;;  %v508_v26 = vpack.c.bf16 %v505_v24, %v505_v24 }
 0x2b9   :  { %847 = vtanh.f32 %v515_v25  ;;  %v510_v27 = vunpack.c.l.bf16 %v508_v26 }
 0x2bb   :  { %v512_v28 = vmul.f32 0.5, %v510_v27 }
 0x2bd   :  { %v514_v29 = vpack.c.bf16 %v512_v28, %v512_v28 }
 0x2bf   :  { %v848_v30 = vpop.eup %847  ;;  %v516_v31 = vunpack.c.l.bf16 %v514_v29 }
 0x2c0   :  { %v519_v32 = vpack.c.bf16 %v848_v30, %v848_v30 }
 0x2c1   :  { %849 = vtanh.f32 %v516_v31 }
 0x2c2   :  { %v521_v33 = vunpack.c.l.bf16 %v519_v32 }
 0x2c4   :  { %v523_v34 = vmul.f32 0.5, %v521_v33 }
 0x2c6   :  { %v525_v37 = vpack.c.bf16 %v523_v34, %v523_v34 }
 0x2c7   :  { %v850_v35 = vpop.eup %849 }
 0x2c8   :  { %v520_v36 = vpack.c.bf16 %v850_v35, %v850_v35  ;;  %v527_v40 = vunpack.c.l.bf16 %v525_v37 }
 0x2ca   :  { %v522_v38 = vunpack.c.l.bf16 %v520_v36  ;;  %v529_v43 = vadd.f32 0.5, %v527_v40 }
 0x2cc   :  { %v524_v39 = vmul.f32 0.5, %v522_v38 }
 0x2ce   :  { %v526_v41 = vpack.c.bf16 %v524_v39, %v524_v39 }
 0x2d0   :  { %v528_v42 = vunpack.c.l.bf16 %v526_v41 }
 0x2d2   :  { %v530_v44 = vadd.f32 0.5, %v528_v42 }
 0x2d4   :  { %v531_v45 = vpack.c.bf16 %v530_v44, %v529_v43 }
 0x2d6   :  { %786 = vmatmul.msk.bf16.vlgmr.msrb.gmra.mxu0 %vm485_vm2, %v531_v45 }
 0x353   :  { %v558_v47 = vpop.f32.mrf.mxu0 }
 0x354   :  { %v559_v48 = vadd.f32 %v833_v46, %v558_v47 }
 0x356   :  { %v563_v49 = vpack.c.bf16 %v559_v48, %v559_v48 }
 0x358   :  { %v565_v53 = vunpack.c.l.bf16 %v563_v49 }
 0x35a   :  { %v567_v55 = vmul.f32 0.5, %v565_v53 }
 0x35b   :  { %v560_v56 = vpop.f32.mrf.mxu0 }
 0x35c   :  { %v569_v57 = vpack.c.bf16 %v567_v55, %v567_v55  ;;  %v561_v58 = vadd.f32 %v833_v46, %v560_v56 }
 0x35e   :  { %v571_v59 = vunpack.c.l.bf16 %v569_v57  ;;  %v564_v60 = vpack.c.bf16 %v561_v58, %v561_v58 }
 0x360   :  { %851 = vtanh.f32 %v571_v59  ;;  %v566_v61 = vunpack.c.l.bf16 %v564_v60 }
 0x362   :  { %v568_v62 = vmul.f32 0.5, %v566_v61 }
 0x364   :  { %v570_v63 = vpack.c.bf16 %v568_v62, %v568_v62 }
 0x366   :  { %v852_v0 = vpop.eup %851  ;;  %v572_v1 = vunpack.c.l.bf16 %v570_v63 }
 0x367   :  { %v575_v2 = vpack.c.bf16 %v852_v0, %v852_v0 }
 0x368   :  { %853 = vtanh.f32 %v572_v1 }
 0x369   :  { %v577_v3 = vunpack.c.l.bf16 %v575_v2 }
 0x36b   :  { %v579_v4 = vmul.f32 0.5, %v577_v3 }
 0x36d   :  { %v581_v7 = vpack.c.bf16 %v579_v4, %v579_v4 }
 0x36e   :  { %v854_v5 = vpop.eup %853 }
 0x36f   :  { %v576_v6 = vpack.c.bf16 %v854_v5, %v854_v5  ;;  %v583_v10 = vunpack.c.l.bf16 %v581_v7 }
 0x371   :  { %v578_v8 = vunpack.c.l.bf16 %v576_v6  ;;  %v585_v13 = vadd.f32 0.5, %v583_v10 }
 0x373   :  { %v580_v9 = vmul.f32 0.5, %v578_v8 }
 0x375   :  { %v582_v11 = vpack.c.bf16 %v580_v9, %v580_v9 }
 0x377   :  { %v584_v12 = vunpack.c.l.bf16 %v582_v11 }
 0x379   :  { %v586_v14 = vadd.f32 0.5, %v584_v12 }
 0x37b   :  { %v587_v15 = vpack.c.bf16 %v586_v14, %v585_v13 }
 0x37d   :  { %791 = vmatmul.msk.bf16.vlgmr.msrb.gmra.mxu1 %vm485_vm2, %v587_v15 }
 0x3fa   :  { %v614_v17 = vpop.f32.mrf.mxu1 }
 0x3fb   :  { %v615_v18 = vadd.f32 %v834_v16, %v614_v17 }
 0x3fd   :  { %v619_v19 = vsel %vm485_vm2, %v615_v18, -inf }
 0x3fe   :  { %620 = vmax.xlane.f32.xlu0 %v619_v19 }
 0x402   :  { %v616_v20 = vpop.f32.mrf.mxu1 }
 0x403   :  { %v617_v21 = vadd.f32 %v834_v16, %v616_v20 }
 0x405   :  { %v622_v22 = vsel %vm485_vm2, %v617_v21, -inf }
 0x406   :  { %623 = vmax.xlane.f32.xlu0 %v622_v22 }
 0x471   :  { %v621_v23 = vpop.xlane.xlu0 %620 }
 0x472   :  { %v625_v24 = vsub.f32 %v615_v18, %v621_v23 }
 0x474   :  { %v627_v25 = vmul.f32 1.442695, %v625_v24 }
 0x476   :  { %855 = vpow2.f32 %v627_v25 }
 0x479   :  { %v624_v26 = vpop.xlane.xlu0 %623 }
 0x47a   :  { %v626_v27 = vsub.f32 %v617_v21, %v624_v26 }
 0x47c   :  { %v856_v28 = vpop.eup %855  ;;  %v629_v29 = vmul.f32 1.442695, %v626_v27 }
 0x47d   :  { %v631_v30 = vsel %vm485_vm2, %v856_v28, 0.0 }
 0x47e   :  { %857 = vpow2.f32 %v629_v29  ;;  %632 = vadd.xlane.f32.xlu1 %v631_v30 }
 0x484   :  { %v858_v31 = vpop.eup %857 }
 0x485   :  { %v634_v32 = vsel %vm485_vm2, %v858_v31, 0.0 }
 0x486   :  { %635 = vadd.xlane.f32.xlu1 %v634_v32 }
 0x4f1   :  { %v633_v33 = vpop.xlane.xlu1 %632 }
 0x4f2   :  { %859 = vlog2.f32 %v633_v33 }
 0x4f8   :  { %v860_v34 = vpop.eup %859 }
 0x4f9   :  { %v638_v35 = vmul.f32 0.6931472, %v860_v34  ;;  %v636_v36 = vpop.xlane.xlu1 %635 }
 0x4fa   :  { %861 = vlog2.f32 %v636_v36 }
 0x4fb   :  { %v641_v37 = vsub.f32 %v625_v24, %v638_v35 }
 0x4fd   :  { %643 = vst.msk [vmem:[#allocation5] sm:$0xff] %vm485_vm2, %v641_v37 }
 0x500   :  { %v862_v38 = vpop.eup %861 }
 0x501   :  { %v640_v39 = vmul.f32 0.6931472, %v862_v38 }
 0x503   :  { %v642_v40 = vsub.f32 %v626_v27, %v640_v39 }
 0x505   :  { %644 = vst.msk [vmem:[#allocation5 + $0x8] sm:$0xff] %vm485_vm2, %v642_v40 }
 0x506   :  { %648 = vsyncadd [#allocation4], 224  ;;  %s651_s29 = sshll.u32 %s1118_s13, 4  ;;  %s918_s0 = smov [#allocation5]   ;;  %s652_s29 = int_to_ptr.hbm [resolvable:$true] %s651_s29 }
 0x507   :  { %s649_s30 = sshll.u32 %s918_s0, 4  ;;  %s919_s14 = smov 32   ;;  %s650_s30 = int_to_ptr.vmem [resolvable:$true] %s649_s30 }
 0x508   :  { %s920_s15 = smov 2  }
 0x509   :  { %657 = dma.vmem_to_hbm [thread:$0]  %s650_s30, 32, %s652_s29, [#allocation4], %s919_s14, %s919_s14, %s920_s15  }
 0x50a   :  { %913 = dma.done.wait [#allocation4], 256  }
 0x50b   :  { %914 = vsyncadd [#allocation4], 4294967040 }
 0x50c   :  { %662 = vsyncpa [#allocation3], 1 }
 0x50d   :  { %663 = vsyncpa [#allocation4], 1 }

</bundles_post_ra>
